<compile_context>
chip_gen: v7x
topology: tpu7x:2x2x1
jax: 0.10.0
libtpu: 0.0.40
codegen_flags: <defaults>
</compile_context>

<pallas_src>
import jax
import jax.numpy as jnp
import numpy as np
from jax.experimental import pallas as pl
from jax.experimental.pallas import tpu as pltpu


def _choose_tiles(B, C, HW, itemsize):
    """Pick (Bt, hw_chunk) tile sizes for the (B, C, HW) input.

    Targets ~1 MiB input tiles (near the HBM roofline) while keeping the
    double-buffered footprint comfortably inside every generation's scoped
    VMEM (v5e 16 MiB default, v6e/v7x 32 MiB, v7x 64 MiB physical), and keeps
    at least two batch-parallel grid steps so v7x's two TensorCores are fed.
    """
    target_tile_bytes = 1 << 20   # ~1 MiB per input tile
    max_tile_bytes = 4 << 20      # x2 double-buffer => <= 8 MiB, safe on v5e

    # HW chunk: lane axis must be a multiple of 128 (or the full extent) and
    # must divide HW exactly so the pooled mean never reads out-of-bounds.
    hw_chunk = HW
    if C * HW * itemsize > max_tile_bytes and HW % 128 == 0:
        budget = max(128, ((max_tile_bytes // (C * itemsize)) // 128) * 128)
        cand = min(HW, budget)
        while cand >= 128 and HW % cand != 0:
            cand -= 128
        if cand >= 128:
            hw_chunk = cand

    # Batch tile: largest divisor of B within the ~1 MiB target, but keep
    # >= 2 batch grid steps when B >= 2 (v7x megacore; free on v5e/v6e).
    per_b_bytes = C * hw_chunk * itemsize
    bt_cap = max(1, min(B, target_tile_bytes // max(per_b_bytes, 1)))
    if B >= 2:
        bt_cap = min(bt_cap, max(1, B // 2))
    Bt = 1
    for d in range(1, int(bt_cap) + 1):
        if B % d == 0:
            Bt = d
    return Bt, hw_chunk


def channel_attention_forward(x, params, *, reduction=16):
    """Pallas implementation of Channel_Attention.forward.

    x: (B, C, H, W) float32 or bfloat16 (NCHW, matching PyTorch).
    Returns: (B, C, 1, 1) float32 channel-attention gates.
    """
    B, C, H, W = x.shape
    Cr = C // reduction
    HW = H * W
    inv_hw = 1.0 / float(HW)
    f32 = jnp.float32

    # Wrapper-side layout plumbing only (free metadata reshape, NO dtype cast):
    # lane-dense flattened HW view.  Upcast to f32 happens inside the kernel.
    x_flat = x.reshape(B, C, HW)

    Bt, hw_chunk = _choose_tiles(B, C, HW, x_flat.dtype.itemsize)
    n_b = B // Bt
    n_k = HW // hw_chunk

    # Static (trace-time) choice of the MLP formulation: MXU matmuls for big
    # tiles/channels, VPU rank-1 updates for the tiny-bottleneck SE case.
    use_mxu = (Cr >= 8) and (C >= 128) and (Bt >= 8)

    w1 = params["fc_w1"].astype(f32)                   # (Cr, C)  fc1.weight
    w1_in = w1.T if use_mxu else w1                    # (C, Cr) or (Cr, C)
    b1 = params["fc_b1"].reshape(1, Cr).astype(f32)    # (1, Cr)  fc1.bias
    w2t = params["fc_w2"].T.astype(f32)                # (Cr, C)  fc2.weight^T
    b2 = params["fc_b2"].reshape(1, C).astype(f32)     # (1, C)   fc2.bias

    def kernel(x_ref, w1_ref, b1_ref, w2t_ref, b2_ref, out_ref, acc_ref):
        k = pl.program_id(1)

        @pl.when(k == 0)
        def _():
            acc_ref[...] = jnp.zeros_like(acc_ref)

        # Partial global sum over the lane-dense HW chunk; upcast in-kernel so
        # bf16 inputs stream at half the bytes and accumulate in f32.
        acc_ref[...] += jnp.sum(x_ref[...].astype(jnp.float32), axis=-1)

        @pl.when(k == pl.num_programs(1) - 1)
        def _():
            pooled = acc_ref[...] * inv_hw                          # (Bt, C)
            if use_mxu:
                h = jnp.dot(pooled, w1_ref[...],
                            preferred_element_type=jnp.float32) + b1_ref[...]
                h = jnp.maximum(h, 0.0)                             # (Bt, Cr)
                gates = jnp.dot(h, w2t_ref[...],
                                preferred_element_type=jnp.float32) + b2_ref[...]
            else:
                # VPU rank-1 form, batched over Bt, unrolled over tiny Cr.
                gates = jnp.broadcast_to(b2_ref[...], (Bt, C))      # hoisted bias
                for j in range(Cr):
                    hj = jnp.sum(pooled * w1_ref[j:j + 1, :],
                                 axis=-1, keepdims=True)            # (Bt, 1)
                    hj = jnp.maximum(hj + b1_ref[0:1, j:j + 1], 0.0)
                    gates = gates + hj * w2t_ref[j:j + 1, :]        # rank-1 update
            # Single dense (Bt, 1, C) store per batch tile.
            out_ref[...] = jax.nn.sigmoid(gates).astype(
                out_ref.dtype).reshape(Bt, 1, C)

    tile_bytes = Bt * C * hw_chunk * x_flat.dtype.itemsize
    vmem_limit = int(min(64 << 20, max(16 << 20, 4 * tile_bytes + (1 << 20))))

    out = pl.pallas_call(
        kernel,
        out_shape=jax.ShapeDtypeStruct((B, 1, C), f32),
        grid=(n_b, n_k),
        in_specs=[
            pl.BlockSpec((Bt, C, hw_chunk), lambda b, k: (b, 0, k)),  # x slab
            pl.BlockSpec(w1_in.shape, lambda b, k: (0, 0)),           # fc1 w (resident)
            pl.BlockSpec((1, Cr), lambda b, k: (0, 0)),               # fc1 b
            pl.BlockSpec((Cr, C), lambda b, k: (0, 0)),               # fc2 w^T
            pl.BlockSpec((1, C), lambda b, k: (0, 0)),                # fc2 b
        ],
        out_specs=pl.BlockSpec((Bt, 1, C), lambda b, k: (b, 0, 0)),
        scratch_shapes=[pltpu.VMEM((Bt, C), jnp.float32)],            # pooled acc
        compiler_params=pltpu.CompilerParams(
            dimension_semantics=("parallel", "arbitrary"),
            vmem_limit_bytes=vmem_limit),
    )(x_flat, w1_in, b1, w2t, b2)

    return out.reshape(B, C, 1, 1)


def channel_attention_reference(x, p):
    """Pure-JAX reference of the PyTorch forward."""
    B, C, H, W = x.shape
    pooled = jnp.mean(x.astype(jnp.float32), axis=(2, 3))           # (B, C)
    h = jnp.maximum(pooled @ p["fc_w1"].T + p["fc_b1"], 0.0)        # (B, Cr)
    y = jax.nn.sigmoid(h @ p["fc_w2"].T + p["fc_b2"])               # (B, C)
    return y.reshape(B, C, 1, 1)


if __name__ == "__main__":
    B, C, H, W = 2, 32, 16, 16
    reduction = 16
    Cr = C // reduction

    key = jax.random.PRNGKey(0)
    ks = jax.random.split(key, 5)

    def u(k, shape, scale=0.3):
        return jax.random.uniform(k, shape, jnp.float32, -scale, scale)

    params = {
        "fc_w1": u(ks[0], (Cr, C)),   # nn.Linear(C, Cr).weight
        "fc_b1": u(ks[1], (Cr,)),     # nn.Linear(C, Cr).bias
        "fc_w2": u(ks[2], (C, Cr)),   # nn.Linear(Cr, C).weight
        "fc_b2": u(ks[3], (C,)),      # nn.Linear(Cr, C).bias
    }
    x = jax.random.normal(ks[4], (B, C, H, W), jnp.float32)

    y = channel_attention_forward(x, params, reduction=reduction)
    y = jax.block_until_ready(y)

    y_ref = jax.block_until_ready(channel_attention_reference(x, params))
    np.testing.assert_allclose(np.asarray(y), np.asarray(y_ref),
                               rtol=1e-5, atol=1e-5)

    print("KERNEL_OK")
</pallas_src>

<mosaic_0001>
module attributes {stable_mosaic.version = 11 : i64} {
  func.func @kernel(%arg0: i32, %arg1: i32, %arg2: memref<1x32x256xf32, #tpu.memory_space<vmem>>, %arg3: memref<2x32xf32, #tpu.memory_space<vmem>>, %arg4: memref<1x2xf32, #tpu.memory_space<vmem>>, %arg5: memref<2x32xf32, #tpu.memory_space<vmem>>, %arg6: memref<1x32xf32, #tpu.memory_space<vmem>>, %arg7: memref<1x1x32xf32, #tpu.memory_space<vmem>>, %arg8: memref<1x32xf32, #tpu.memory_space<vmem>>) attributes {dimension_semantics = [#tpu.dimension_semantics<parallel>, #tpu.dimension_semantics<arbitrary>], iteration_bounds = array<i64: 2, 1>, scalar_prefetch = 0 : i64, scratch_operands = 1 : i64, tpu.core_type = #tpu.core_type<tc>, window_params = [{transform_indices = @transform_0, window_bounds = array<i64: 1, 32, 256>}, {pipeline_mode = #tpu.pipeline_mode<synchronous>, transform_indices = @transform_1, window_bounds = array<i64: 2, 32>}, {pipeline_mode = #tpu.pipeline_mode<synchronous>, transform_indices = @transform_2, window_bounds = array<i64: 1, 2>}, {pipeline_mode = #tpu.pipeline_mode<synchronous>, transform_indices = @transform_3, window_bounds = array<i64: 2, 32>}, {pipeline_mode = #tpu.pipeline_mode<synchronous>, transform_indices = @transform_4, window_bounds = array<i64: 1, 32>}, {transform_indices = @transform_5, window_bounds = array<i64: 1, 1, 32>}]} {
    %c0_i32 = arith.constant 0 : i32
    %0 = arith.cmpi eq, %arg1, %c0_i32 : i32
    %1 = arith.extui %0 : i1 to i32
    %c0_i32_0 = arith.constant 0 : i32
    %2 = arith.cmpi ne, %1, %c0_i32_0 : i32
    scf.if %2 {
      %cst_9 = arith.constant 0.000000e+00 : f32
      %11 = vector.broadcast %cst_9 : f32 to vector<1x32xf32>
      %c0_10 = arith.constant 0 : index
      %c0_11 = arith.constant 0 : index
      %12 = vector.load %arg8[%c0_10, %c0_11] : memref<1x32xf32, #tpu.memory_space<vmem>>, vector<1x32xf32>
      tpu.vector_store %arg8[%c0_10, %c0_11], %11 {strides = array<i32>} : memref<1x32xf32, #tpu.memory_space<vmem>>, vector<1x32xf32>,
    } else {
    }
    %c0 = arith.constant 0 : index
    %c0_1 = arith.constant 0 : index
    %3 = vector.load %arg8[%c0, %c0_1] : memref<1x32xf32, #tpu.memory_space<vmem>>, vector<1x32xf32>
    %c0_2 = arith.constant 0 : index
    %c0_3 = arith.constant 0 : index
    %c0_4 = arith.constant 0 : index
    %4 = vector.load %arg2[%c0_2, %c0_3, %c0_4] : memref<1x32x256xf32, #tpu.memory_space<vmem>>, vector<1x32x256xf32>
    %cst = arith.constant dense<0.000000e+00> : vector<1x32xf32>
    %5 = vector.multi_reduction <add>, %4, %cst [2] : vector<1x32x256xf32> to vector<1x32xf32>
    %6 = arith.addf %3, %5 : vector<1x32xf32>
    %c0_5 = arith.constant 0 : index
    %c0_6 = arith.constant 0 : index
    %7 = vector.load %arg8[%c0_5, %c0_6] : memref<1x32xf32, #tpu.memory_space<vmem>>, vector<1x32xf32>
    tpu.vector_store %arg8[%c0_5, %c0_6], %6 {strides = array<i32>} : memref<1x32xf32, #tpu.memory_space<vmem>>, vector<1x32xf32>,
    %c0_i32_7 = arith.constant 0 : i32
    %8 = arith.cmpi eq, %arg1, %c0_i32_7 : i32
    %9 = arith.extui %8 : i1 to i32
    %c0_i32_8 = arith.constant 0 : i32
    %10 = arith.cmpi ne, %9, %c0_i32_8 : i32
    scf.if %10 {
      %c0_9 = arith.constant 0 : index
      %c0_10 = arith.constant 0 : index
      %11 = vector.load %arg8[%c0_9, %c0_10] : memref<1x32xf32, #tpu.memory_space<vmem>>, vector<1x32xf32>
      %cst_11 = arith.constant 3.906250e-03 : f32
      %12 = vector.broadcast %cst_11 : f32 to vector<1x32xf32>
      %13 = arith.mulf %11, %12 : vector<1x32xf32>
      %c0_12 = arith.constant 0 : index
      %c0_13 = arith.constant 0 : index
      %14 = vector.load %arg6[%c0_12, %c0_13] : memref<1x32xf32, #tpu.memory_space<vmem>>, vector<1x32xf32>
      %c0_14 = arith.constant 0 : index
      %c0_15 = arith.constant 0 : index
      %15 = vector.load %arg3[%c0_14, %c0_15] : memref<2x32xf32, #tpu.memory_space<vmem>>, vector<1x32xf32>
      %16 = arith.mulf %13, %15 : vector<1x32xf32>
      %cst_16 = arith.constant dense<0.000000e+00> : vector<1xf32>
      %17 = vector.multi_reduction <add>, %16, %cst_16 [1] : vector<1x32xf32> to vector<1xf32>
      %18 = vector.shape_cast %17 : vector<1xf32> to vector<1x1xf32>
      %c0_17 = arith.constant 0 : index
      %c0_18 = arith.constant 0 : index
      %19 = vector.load %arg4[%c0_17, %c0_18] : memref<1x2xf32, #tpu.memory_space<vmem>>, vector<1x1xf32>
      %20 = arith.addf %18, %19 : vector<1x1xf32>
      %cst_19 = arith.constant 0.000000e+00 : f32
      %21 = vector.broadcast %cst_19 : f32 to vector<1x1xf32>
      %22 = arith.maximumf %20, %21 : vector<1x1xf32>
      %c0_20 = arith.constant 0 : index
      %c0_21 = arith.constant 0 : index
      %23 = vector.load %arg5[%c0_20, %c0_21] : memref<2x32xf32, #tpu.memory_space<vmem>>, vector<1x32xf32>
      %24 = vector.broadcast %22 : vector<1x1xf32> to vector<1x32xf32>
      %25 = arith.mulf %24, %23 : vector<1x32xf32>
      %26 = arith.addf %14, %25 : vector<1x32xf32>
      %c1 = arith.constant 1 : index
      %c0_22 = arith.constant 0 : index
      %27 = vector.load %arg3[%c1, %c0_22] : memref<2x32xf32, #tpu.memory_space<vmem>>, vector<1x32xf32>
      %28 = arith.mulf %13, %27 : vector<1x32xf32>
      %cst_23 = arith.constant dense<0.000000e+00> : vector<1xf32>
      %29 = vector.multi_reduction <add>, %28, %cst_23 [1] : vector<1x32xf32> to vector<1xf32>
      %30 = vector.shape_cast %29 : vector<1xf32> to vector<1x1xf32>
      %c0_24 = arith.constant 0 : index
      %c1_25 = arith.constant 1 : index
      %31 = vector.load %arg4[%c0_24, %c1_25] : memref<1x2xf32, #tpu.memory_space<vmem>>, vector<1x1xf32>
      %32 = arith.addf %30, %31 : vector<1x1xf32>
      %cst_26 = arith.constant 0.000000e+00 : f32
      %33 = vector.broadcast %cst_26 : f32 to vector<1x1xf32>
      %34 = arith.maximumf %32, %33 : vector<1x1xf32>
      %c1_27 = arith.constant 1 : index
      %c0_28 = arith.constant 0 : index
      %35 = vector.load %arg5[%c1_27, %c0_28] : memref<2x32xf32, #tpu.memory_space<vmem>>, vector<1x32xf32>
      %36 = vector.broadcast %34 : vector<1x1xf32> to vector<1x32xf32>
      %37 = arith.mulf %36, %35 : vector<1x32xf32>
      %38 = arith.addf %26, %37 : vector<1x32xf32>
      %39 = arith.negf %38 : vector<1x32xf32>
      %40 = math.exp %39 : vector<1x32xf32>
      %cst_29 = arith.constant 1.000000e+00 : f32
      %41 = vector.broadcast %cst_29 : f32 to vector<1x32xf32>
      %42 = arith.addf %41, %40 : vector<1x32xf32>
      %43 = arith.divf %41, %42 : vector<1x32xf32>
      %44 = vector.shape_cast %43 : vector<1x32xf32> to vector<1x1x32xf32>
      %c0_30 = arith.constant 0 : index
      %c0_31 = arith.constant 0 : index
      %c0_32 = arith.constant 0 : index
      %45 = vector.load %arg7[%c0_30, %c0_31, %c0_32] : memref<1x1x32xf32, #tpu.memory_space<vmem>>, vector<1x1x32xf32>
      tpu.vector_store %arg7[%c0_30, %c0_31, %c0_32], %44 {strides = array<i32>} : memref<1x1x32xf32, #tpu.memory_space<vmem>>, vector<1x1x32xf32>,
    } else {
    }
    return
  }
  func.func @transform_0(%arg0: i32, %arg1: i32) -> (i32, i32, i32) {
    %c0_i32 = arith.constant 0 : i32
    %c0_i32_0 = arith.constant 0 : i32
    return %arg0, %c0_i32, %arg1 : i32, i32, i32
  }
  func.func @transform_1(%arg0: i32, %arg1: i32) -> (i32, i32) {
    %c0_i32 = arith.constant 0 : i32
    %c0_i32_0 = arith.constant 0 : i32
    %c0_i32_1 = arith.constant 0 : i32
    return %c0_i32, %c0_i32_0 : i32, i32
  }
  func.func @transform_2(%arg0: i32, %arg1: i32) -> (i32, i32) {
    %c0_i32 = arith.constant 0 : i32
    %c0_i32_0 = arith.constant 0 : i32
    %c0_i32_1 = arith.constant 0 : i32
    return %c0_i32, %c0_i32_0 : i32, i32
  }
  func.func @transform_3(%arg0: i32, %arg1: i32) -> (i32, i32) {
    %c0_i32 = arith.constant 0 : i32
    %c0_i32_0 = arith.constant 0 : i32
    %c0_i32_1 = arith.constant 0 : i32
    return %c0_i32, %c0_i32_0 : i32, i32
  }
  func.func @transform_4(%arg0: i32, %arg1: i32) -> (i32, i32) {
    %c0_i32 = arith.constant 0 : i32
    %c0_i32_0 = arith.constant 0 : i32
    %c0_i32_1 = arith.constant 0 : i32
    return %c0_i32, %c0_i32_0 : i32, i32
  }
  func.func @transform_5(%arg0: i32, %arg1: i32) -> (i32, i32, i32) {
    %c0_i32 = arith.constant 0 : i32
    %c0_i32_0 = arith.constant 0 : i32
    %c0_i32_1 = arith.constant 0 : i32
    return %arg0, %c0_i32, %c0_i32_0 : i32, i32, i32
  }
}

</mosaic_0001>

<bundles_post_ra>
// kernel: tpu_custom_call.1
= control target key start
LH: loop header
LB: loop body
LE: loop exit
PB: predicated region body
PF: predicated region fallthrough
CT: control target
= control target key end

     0   :  { %10 = vsyncpa [#allocation4], 0  ;;  %s1344_s0 = inlined_call_operand.hbm [shape: f32[2,32,256], index: 0, kind: input, shape index: {}]   ;;  %s1345_s1 = inlined_call_operand.vmem [shape: f32[2,32], index: 1, kind: input, shape index: {}]   ;;  %s1346_s2 = inlined_call_operand.vmem [shape: f32[1,2], index: 2, kind: input, shape index: {}]   ;;  %s1347_s3 = inlined_call_operand.vmem [shape: f32[2,32], index: 3, kind: input, shape index: {}]   ;;  %s1348_s4 = inlined_call_operand.vmem [shape: f32[1,32], index: 4, kind: input, shape index: {}]   ;;  %s1349_s5 = inlined_call_operand.hbm [shape: f32[2,1,32], index: 5, kind: output, shape index: {}]  }
   0x1   :  { %12 = vsyncpa [#allocation4 + $0x1], 0 }
   0x2   :  { %13 = vsyncpa [#allocation5], 0 }
   0x3   :  { %15 = vsyncpa [#allocation5 + $0x1], 0  ;;  %s1053_s18 = smov 0   ;;  %s1055_s19 = smov 0  }
   0x4   :  { %s1057_s20 = smov 0   ;;  %s1059_s21 = smov 0  }
   0x5   :  { %s1061_s22 = smov 0   ;;  %s1063_s23 = smov 0  }
   0x6 LB: > { %s813_s24 = sadd.s32 4294967295, %s1013_s23   ;;  %s814_s25 = sadd.s32 4294967294, %s1013_s23   ;;  %s1013_s23 = sphi %s1063_s23, %s21_s23   ;;  %s1009_s22 = sphi %s1061_s22, %s1364_s22   ;;  %s1005_s21 = sphi %s1059_s21, %s1363_s21   ;;  %s1001_s20 = sphi %s1057_s20, %s1362_s20   ;;  %s997_s19 = sphi %s1055_s19, %s1361_s19   ;;  %s993_s18 = sphi %s1053_s18, %s1360_s18  }
   0x7   : > { %s33_s26 = sadd.s32 1, %s1009_s22  ;;  %s42_s27 = sadd.s32 1, %s1001_s20 }
   0x8   : > { %p35_p0 = scmp.ge.s32.totalorder %s33_s26, 2  ;;  %p49_p1 = scmp.ne.s32.totalorder %s1001_s20, %s997_s19 }
   0x9   : > { %p50_p2 = scmp.eq.s32.totalorder %s1013_s23, 0  ;;  %p55_p3 = scmp.ne.s32.totalorder %s997_s19, %s993_s18 }
   0xa   : > { %s1366_s26 = smov (%p35_p0, %s33_s26), 0  ;;  %p56_p5 = scmp.eq.s32.totalorder %s813_s24, 0 }
   0xb   : > { %p1094_p4 = por %p50_p2, %p49_p1  ;;  %s37_s29 = ssub.s32 %s1009_s22, %s1366_s26 }
   0xc   : > { %p163_p6 = scmp.eq.s32.totalorder %s813_s24, 1  ;;  %p40_p7 = scmp.eq.s32.totalorder %s37_s29, 0 }
   0xd   : > { %p1100_p8 = por %p56_p5, %p55_p3  ;;  %p169_p10 = scmp.eq.s32.totalorder %s814_s25, 1 }
   0xe   : > { %p1104_p9 = por %p163_p6, %p49_p1  ;;  %p839_p13 = scmp.lt.s32.totalorder %s1013_s23, 2 }
   0xf   : > { %s1109_s7 = scalar_select %p40_p7, %s1001_s20, %s42_s27  }
  0x10   : > { %s1353_s6 = scalar_select %p1104_p9, 1, 0 }
  0x11   : > { %p1111_p11 = por %p169_p10, %p55_p3  ;;  %s201_s9 = sand.u32 1, %s1001_s20  }
  0x12   : > { %s817_s10 = sshll.u32 %s201_s9, 6  ;;  %s826_s11 = sshll.u32 %s1009_s22, 10 }
  0x13   : > { %s1354_s8 = scalar_select %p1111_p11, 1, 0 }
  0x14   : > { %s1122_s14 = scalar_lea.hbm %s1344_s0, %s826_s11  ;;  %s205_s15 = scalar_lea.vmem [#allocation3], %s817_s10 }
  0x15   : > { %s214_s16 = sshll.u32 %s205_s15, 4  ;;  %p1128_p0 = pnand %p839_p13, %p1094_p4  ;;  %s1124_s16 = int_to_ptr.vmem [resolvable:$true] %s214_s16 }
  0x16   : > { %s1133_s24 = scalar_lea.sflag [#allocation4], %s201_s9  ;;  %s901_s25 = scalar_lea.hbm %s1122_s14, 1024 }
  0x17   : > { %p902_p2 = scmp.ne.s32.totalorder %s1122_s14, %s901_s25  ;;  %p903_p3 = pneg %p1128_p0 }
  0x18   : > { %s906_s28 = scalar_lea.hbm %s1344_s0, 2048  ;;  %p907_p4 = scmp.lt.u32.totalorder %s1122_s14, %s1344_s0 }
  0x19   : > { %p904_p5 = pnand %p903_p3, %p902_p2  ;;  %p908_p7 = scmp.lt.u32.totalorder %s906_s28, %s901_s25 }
  0x1a   : > { %p910_p13 = scmp.lt.u32.totalorder %s901_s25, %s1122_s14 }
  0x1b   : > { %p905_p6 = pneg %p904_p5  ;;  %p909_p10 = por %p908_p7, %p907_p4 }
  0x1d   : > { %p911_p12 = por %p910_p13, %p909_p10 }
  0x1f   : > { %p912_p1 = pnand %p911_p12, %p905_p6 }
  0x21   : > { %915 = shalt.err (!%p912_p1)
}
  0x22   : > { %s916_s9 = scalar_lea.vmem %s1124_s16, 1024  ;;  %s1015_s12 = smov [#allocation3]  }
  0x23   : > { %p917_p2 = scmp.ne.s32.totalorder %s1124_s16, %s916_s9  ;;  %s921_s13 = sshll.u32 %s1015_s12, 4  ;;  %s922_s13 = int_to_ptr.vmem [resolvable:$false] %s921_s13 }
  0x24   : > { %s923_s15 = scalar_lea.vmem %s922_s13, 2048  ;;  %p924_p9 = scmp.lt.s32.totalorder %s1124_s16, %s922_s13 }
  0x25   : > { %p919_p5 = pnand %p917_p2, %p903_p3  ;;  %p925_p4 = scmp.lt.s32.totalorder %s923_s15, %s916_s9 }
  0x27   : > { %p920_p11 = pneg %p919_p5  ;;  %p926_p7 = por %p925_p4, %p924_p9 }
  0x29   : > { %p927_p10 = pnand %p926_p7, %p920_p11 }
  0x2b   : > { %930 = shalt.err (!%p927_p10)
}
  0x2c   : > { %s1016_s25 = smov 256   ;;  %s1017_s27 = smov 16  }
  0x2d   : > { %834 = dma.hbm_to_vmem [thread:$0]  (!%p1128_p0), %s1122_s14, 1024, %s1124_s16, %s1133_s24, %s1016_s25, %s1016_s25, %s1017_s27  }
  0x2e   : > { %p222_p12 = scmp.lt.s32.totalorder %s1013_s23, 3  ;;  %p1356_p1 = scmp.ge.s32.totalorder %s1013_s23, 1 }
  0x30   : > { %p223_p3 = pnand %p1356_p1, %p222_p12 }
  0x31   : > { %s1165_s29 = sand.u32 (!%p223_p3), 1, %s997_s19  }
  0x32   : > { %226 = sbr.rel (%p223_p3) target bundleno = 703 (0x2bf), region = 40  ;;  %s821_s28 = sshll.u32 (!%p223_p3), %s1165_s29, 6 }
  0x33   : > { %s229_s10 = scalar_lea.sflag (!%p223_p3), [#allocation4], %s1165_s29  ;;  %s232_s11 = scalar_lea.vmem (!%p223_p3), [#allocation3], %s821_s28 }
  0x39   : > { %984 = dma.done.wait (%p1100_p8), %s229_s10, 1024  }
  0x3a   : > { %986 = vsyncadd (%p1100_p8), %s229_s10, 4294966272  ;;  %v266_v0 = vld [vmem:[%s232_s11] sm:$0xff]  ;;  %v267_v1 = vld [vmem:[%s232_s11 + $0x8] sm:$0xff]  ;;  %v1018_v12 = vmov 0   ;;  %v290_v13 = vlaneseq  ;;  %v1019_v14 = vmov 1966171168  }
  0x3b   : > { %v268_v2 = vld [vmem:[%s232_s11 + $0x10] sm:$0xff]  ;;  %v274_v3 = vadd.f32 %v267_v1, %v266_v0  ;;  %v269_v4 = vld [vmem:[%s232_s11 + $0x18] sm:$0xff]  ;;  %v270_v5 = vld [vmem:[%s232_s11 + $0x20] sm:$0xff]  ;;  %895 = vset.pattern.permute.xlu0 %v1018_v12  ;;  %896 = vset.pattern.permute.xlu1 %v1018_v12  ;;  %v423_v15 = vunpack.c.l.s4 %v1019_v14  ;;  %vm263_vm0 = vcmask 253952   ;;  %vm637_vm1 = vcmask 130112   ;;  %s1021_s12 = smov 127  }
  0x3c   : > { %v271_v6 = vld [vmem:[%s232_s11 + $0x28] sm:$0xff]  ;;  %v272_v8 = vld [vmem:[%s232_s11 + $0x30] sm:$0xff]  ;;  %v273_v9 = vld [vmem:[%s232_s11 + $0x38] sm:$0xff]  ;;  %v277_v10 = vadd.f32 %v269_v4, %v268_v2  ;;  %v1174_v16 = vshrl.u32 %v290_v13, 7  ;;  %vm644_vm2 = vcmask 195712   ;;  %vm651_vm3 = vcmask 261312  }
  0x3d   : > { %v280_v7 = vadd.f32 %v271_v6, %v270_v5  ;;  %275 = vadd.xlane.f32.xlu0 %v274_v3  ;;  %v283_v11 = vadd.f32 %v273_v9, %v272_v8  ;;  %v424_v17 = vunpack.c.0.s8 %v423_v15  ;;  %s823_s11 = sshll.u32 %s1005_s21, 4  ;;  %s257_s30 = scalar_lea.vmem [#allocation6], %s1165_s29 }
  0x3e   : > { %v1177_v18 = vsub.s32 0, %v1174_v16  ;;  %v1180_v19 = vsub.s32 1, %v1174_v16  ;;  %v1183_v20 = vsub.s32 2, %v1174_v16  ;;  %v1186_v21 = vsub.s32 3, %v1174_v16  ;;  %s736_s14 = sshll.u32 %s257_s30, 4  ;;  %s1294_s24 = scalar_lea.hbm %s1349_s5, %s823_s11  ;;  %s1296_s14 = int_to_ptr.vmem [resolvable:$true] %s736_s14 }
  0x3f   : > { %281 = vadd.xlane.f32.xlu1 %v280_v7  ;;  %v1189_v22 = vsub.s32 4, %v1174_v16  ;;  %v1192_v23 = vsub.s32 5, %v1174_v16  ;;  %v1195_v24 = vsub.s32 6, %v1174_v16  ;;  %v1198_v25 = vsub.s32 7, %v1174_v16  ;;  %s724_s9 = scalar_lea.sflag [#allocation5], %s1165_s29  ;;  %p1357_p9 = scmp.ne.s32.totalorder %s1353_s6, 0 }
  0x40   : > { %v1201_v27 = vsub.s32 %v424_v17, %v1174_v16  ;;  %s1022_s21 = smov [#allocation6]  }
  0x41   : > { %278 = vadd.xlane.f32.xlu0 %v277_v10  ;;  %s935_s13 = sshll.u32 %s1022_s21, 4  ;;  %s936_s13 = int_to_ptr.vmem [resolvable:$false] %s935_s13 }
  0x42   : > { %s937_s15 = scalar_lea.vmem %s936_s13, 32  ;;  %p938_p6 = scmp.lt.s32.totalorder %s1296_s14, %s936_s13 }
  0x43   : > { %284 = vadd.xlane.f32.xlu1 %v283_v11 }
  0xca   : > { %v276_v26 = vpop.xlane.xlu0 %275 }
  0xcb   : > { %v293_v29 = vrot.slane %v276_v26, %v1177_v18  ;;  %v297_v30 = vrot.slane %v276_v26, %v1180_v19  ;;  %v301_v31 = vrot.slane %v276_v26, %v1183_v20  ;;  %v305_v32 = vrot.slane %v276_v26, %v1186_v21 }
  0xcc   : > { %v282_v28 = vpop.xlane.xlu1 %281  ;;  %v309_v33 = vrot.slane %v276_v26, %v1189_v22  ;;  %v313_v34 = vrot.slane %v276_v26, %v1192_v23  ;;  %v317_v35 = vrot.slane %v276_v26, %v1195_v24  ;;  %v321_v36 = vrot.slane %v276_v26, %v1198_v25 }
  0xcd   : > { %v418_v37 = vcombine.low %v293_v29, %v297_v30  ;;  %v419_v38 = vcombine.low %v301_v31, %v305_v32  ;;  %v357_v39 = vrot.slane %v282_v28, %v1177_v18  ;;  %v361_v40 = vrot.slane %v282_v28, %v1180_v19 }
  0xce   : > { %v279_v41 = vpop.xlane.xlu0 %278  ;;  %v420_v42 = vcombine.low %v309_v33, %v313_v34  ;;  %v421_v43 = vcombine.low %v317_v35, %v321_v36  ;;  %v365_v44 = vrot.slane %v282_v28, %v1183_v20  ;;  %v369_v45 = vrot.slane %v282_v28, %v1186_v21 }
  0xcf   : > { %v428_v46 = vrot.slane %v418_v37, %v1201_v27  ;;  %v435_v47 = vrot.slane %v419_v38, %v1201_v27  ;;  %v325_v48 = vrot.slane %v279_v41, %v1177_v18  ;;  %v329_v49 = vrot.slane %v279_v41, %v1180_v19 }
  0xd0   : > { %v442_v50 = vrot.slane %v420_v42, %v1201_v27  ;;  %v449_v51 = vrot.slane %v421_v43, %v1201_v27  ;;  %v333_v52 = vrot.slane %v279_v41, %v1183_v20  ;;  %v337_v53 = vrot.slane %v279_v41, %v1186_v21  ;;  %v285_v2 = vpop.xlane.xlu1 %284 }
  0xd1   : > { %v450_v54 = vcombine.low %v428_v46, %v435_v47  ;;  %v341_v55 = vrot.slane %v279_v41, %v1189_v22  ;;  %v345_v56 = vrot.slane %v279_v41, %v1192_v23  ;;  %v349_v57 = vrot.slane %v279_v41, %v1195_v24 }
  0xd2   : > { %v451_v58 = vcombine.low %v442_v50, %v449_v51  ;;  %v353_v59 = vrot.slane %v279_v41, %v1198_v25  ;;  %v467_v60 = vcombine.low %v325_v48, %v329_v49  ;;  %v468_v61 = vcombine.low %v333_v52, %v337_v53 }
  0xd3   : > { %v458_v62 = vrot.slane %v450_v54, %v1201_v27  ;;  %v469_v63 = vcombine.low %v341_v55, %v345_v56  ;;  %v373_v0 = vrot.slane %v282_v28, %v1189_v22  ;;  %v377_v1 = vrot.slane %v282_v28, %v1192_v23 }
  0xd4   : > { %v465_v3 = vrot.slane %v451_v58, %v1201_v27  ;;  %v470_v4 = vcombine.low %v349_v57, %v353_v59  ;;  %v477_v5 = vrot.slane %v467_v60, %v1201_v27  ;;  %v484_v6 = vrot.slane %v468_v61, %v1201_v27 }
  0xd5   : > { %v491_v7 = vrot.slane %v469_v63, %v1201_v27  ;;  %v381_v8 = vrot.slane %v282_v28, %v1195_v24  ;;  %v385_v9 = vrot.slane %v282_v28, %v1198_v25  ;;  %v516_v10 = vcombine.low %v357_v39, %v361_v40 }
  0xd6   : > { %v466_v11 = vcombine.low %v458_v62, %v465_v3  ;;  %v498_v12 = vrot.slane %v470_v4, %v1201_v27  ;;  %v499_v14 = vcombine.low %v477_v5, %v484_v6  ;;  %v517_v15 = vcombine.low %v365_v44, %v369_v45 }
  0xd7   : > { %v518_v17 = vcombine.low %v373_v0, %v377_v1  ;;  %v519_v26 = vcombine.low %v381_v8, %v385_v9  ;;  %v526_v29 = vrot.slane %v516_v10, %v1201_v27  ;;  %v389_v30 = vrot.slane %v285_v2, %v1177_v18 }
  0xd8   : > { %615 = vperm.xlu0 %895, %v466_v11   ;;  %v500_v31 = vcombine.low %v491_v7, %v498_v12  ;;  %v507_v32 = vrot.slane %v499_v14, %v1201_v27  ;;  %v533_v33 = vrot.slane %v517_v15, %v1201_v27  ;;  %v393_v28 = vrot.slane %v285_v2, %v1180_v19 }
  0xd9   : > { %v540_v34 = vrot.slane %v518_v17, %v1201_v27  ;;  %v547_v35 = vrot.slane %v519_v26, %v1201_v27  ;;  %v397_v36 = vrot.slane %v285_v2, %v1183_v20  ;;  %v401_v37 = vrot.slane %v285_v2, %v1186_v21  ;;  %v677_v17 = vld [vmem:[%s1345_s1] sm:$0x1] }
  0xda   : > { %v514_v38 = vrot.slane %v500_v31, %v1201_v27  ;;  %v548_v39 = vcombine.low %v526_v29, %v533_v33  ;;  %v405_v40 = vrot.slane %v285_v2, %v1189_v22  ;;  %v409_v41 = vrot.slane %v285_v2, %v1192_v23 }
  0xdb   : > { %v549_v42 = vcombine.low %v540_v34, %v547_v35  ;;  %v413_v43 = vrot.slane %v285_v2, %v1195_v24  ;;  %v417_v19 = vrot.slane %v285_v2, %v1198_v25  ;;  %v565_v44 = vcombine.low %v389_v30, %v393_v28 }
  0xdc   : > { %v515_v45 = vcombine.low %v507_v32, %v514_v38  ;;  %v556_v46 = vrot.slane %v548_v39, %v1201_v27  ;;  %v566_v47 = vcombine.low %v397_v36, %v401_v37  ;;  %v567_v20 = vcombine.low %v405_v40, %v409_v41  ;;  %v685_v40 = vld [vmem:[%s1347_s3] sm:$0x1] }
  0xdd   : > { %v563_v21 = vrot.slane %v549_v42, %v1201_v27  ;;  %v568_v48 = vcombine.low %v413_v43, %v417_v19  ;;  %v575_v49 = vrot.slane %v565_v44, %v1201_v27  ;;  %v1020_v55 = vmov 0.0   ;;  %v708_v43 = vld [vmem:[%s1347_s3 + $0x1] sm:$0x1] }
  0xde   : > { %618 = vperm.xlu1 %896, %v515_v45   ;;  %v582_v22 = vrot.slane %v566_v47, %v1201_v27  ;;  %v589_v23 = vrot.slane %v567_v20, %v1201_v27  ;;  %264 = vst.msk [vmem:[#allocation2] sm:$0x1] %vm263_vm0, %v1020_v55  ;;  %v627_v56 = vand.u32 127, %v290_v13 }
  0xdf   : > { %v564_v50 = vcombine.low %v556_v46, %v563_v21  ;;  %v596_v24 = vrot.slane %v568_v48, %v1201_v27 }
  0xe0   : > { %v597_v25 = vcombine.low %v575_v49, %v582_v22  ;;  %v632_v57 = vadd.s32 4294967288, %v627_v56  ;;  %v639_v58 = vadd.s32 4294967280, %v627_v56  ;;  %v646_v61 = vadd.s32 4294967272, %v627_v56 }
  0xe1   : > { %v598_v51 = vcombine.low %v589_v23, %v596_v24  ;;  %v630_v63 = vsub.s32 %v627_v56, %v1174_v16 }
  0xe2   : > { %621 = vperm.xlu1 %896, %v564_v50   ;;  %v605_v52 = vrot.slane %v597_v25, %v1201_v27  ;;  %v635_v60 = vsub.s32 %v632_v57, %v1174_v16  ;;  %v642_v62 = vsub.s32 %v639_v58, %v1174_v16  ;;  %v649_v3 = vsub.s32 %v646_v61, %v1174_v16  ;;  %v693_v16 = vld [vmem:[%s1345_s1 + $0x1] sm:$0x1] }
  0xe3   : > { %v612_v53 = vrot.slane %v598_v51, %v1201_v27 }
  0xe5   : > { %v613_v54 = vcombine.low %v605_v52, %v612_v53  ;;  %v265_v11 = vld [vmem:[#allocation2] sm:$0x1] }
  0xe7   : > { %624 = vperm.xlu1 %896, %v613_v54  }
 0x157   : > { %v616_v1 = vpop.permute.xlu0 %615 }
 0x158   : > { %v631_v5 = vrot.slane %v616_v1, %v630_v63 }
 0x15d   : > { %v619_v59 = vpop.permute.xlu1 %618 }
 0x15e   : > { %v636_v2 = vrot.slane %v619_v59, %v635_v60 }
 0x160   : > { %v638_v6 = vsel %vm637_vm1, %v636_v2, %v631_v5 }
 0x161   : > { %v622_v0 = vpop.permute.xlu1 %621 }
 0x162   : > { %v643_v4 = vrot.slane %v622_v0, %v642_v62 }
 0x164   : > { %v645_v8 = vsel %vm644_vm2, %v643_v4, %v638_v6 }
 0x166   : > { %v625_v13 = vpop.permute.xlu1 %624 }
 0x167   : > { %v650_v7 = vrot.slane %v625_v13, %v649_v3 }
 0x169   : > { %v652_v9 = vsel %vm651_vm3, %v650_v7, %v645_v8 }
 0x16a   : > { %v659_v10 = vrot.slane %v652_v9, %v1201_v27 }
 0x16c   : > { %v666_v12 = vrot.slane %v659_v10, %v1201_v27  ;;  %v682_v27 = vld [vmem:[%s1346_s2] sm:$0x1] }
 0x16d   : > { %v702_v33 = vrot.slane %v682_v27, %v1177_v18  ;;  %v676_v18 = vld [vmem:[%s1348_s4] sm:$0x1] }
 0x16e   : > { %v668_v14 = vadd.f32 %v666_v12, %v265_v11 }
 0x170   : > { %670 = vst.msk [vmem:[#allocation2] sm:$0x1] %vm263_vm0, %v668_v14 }
 0x177   : > { %v674_v15 = vld [vmem:[#allocation2] sm:$0x1] }
 0x178   : > { %v675_v26 = vmul.f32 0.00390625, %v674_v15 }
 0x17a   : > { %v694_v29 = vmul.f32 %v693_v16, %v675_v26  ;;  %v678_v30 = vmul.f32 %v677_v17, %v675_v26 }
 0x17c   : > { %v695_v31 = vsel %vm263_vm0, %v694_v29, 0.0  ;;  %v679_v32 = vsel %vm263_vm0, %v678_v30, 0.0 }
 0x17d   : > { %696 = vadd.xlane.f32.xlu0 %v695_v31  ;;  %680 = vadd.xlane.f32.xlu1 %v679_v32 }
 0x18e   : > { %703 = vrot.lane.b32.xlu1 %v702_v33, %s1021_s12  ;;  %s931_s12 = scalar_lea.vmem %s1296_s14, 16 }
 0x18f   : > { %p932_p8 = scmp.ne.s32.totalorder %s1296_s14, %s931_s12  ;;  %p939_p13 = scmp.lt.s32.totalorder %s937_s15, %s931_s12 }
 0x191   : > { %p933_p11 = pnand %p932_p8, %p1357_p9  ;;  %p940_p2 = por %p939_p13, %p938_p6 }
 0x193   : > { %p934_p0 = pneg %p933_p11 }
 0x195   : > { %p941_p5 = pnand %p940_p2, %p934_p0 }
 0x20a   : > { %v681_v28 = vpop.xlane.xlu1 %680  ;;  %v697_v36 = vpop.xlane.xlu0 %696 }
 0x20b   : > { %v683_v34 = vadd.f32 %v682_v27, %v681_v28 }
 0x20d   : > { %v684_v35 = vmax.f32 %v683_v34, 0.0 }
 0x20e   : > { %v704_v37 = vpop.permute.xlu1 %703 }
 0x20f   : > { %v706_v38 = vadd.f32 %v704_v37, %v697_v36  ;;  %688 = vperm.xlu0 %895, %v684_v35  }
 0x211   : > { %v707_v39 = vmax.f32 %v706_v38, 0.0 }
 0x213   : > { %711 = vperm.xlu1 %896, %v707_v39  }
 0x28e   : > { %v689_v41 = vpop.permute.xlu0 %688 }
 0x28f   : > { %v691_v42 = vmul.f32 %v689_v41, %v685_v40 }
 0x291   : > { %v692_v44 = vadd.f32 %v691_v42, %v676_v18 }
 0x292   : > { %v712_v19 = vpop.permute.xlu1 %711 }
 0x293   : > { %v714_v45 = vmul.f32 %v712_v19, %v708_v43 }
 0x295   : > { %v715_v46 = vadd.f32 %v714_v45, %v692_v44 }
 0x297   : > { %v822_v47 = vmul.f32 -1.442695, %v715_v46 }
 0x299   : > { %897 = vpow2.f32 %v822_v47 }
 0x2a3   : > { %v898_v20 = vpop.eup %897 }
 0x2a4   : > { %v719_v21 = vadd.f32 1.0, %v898_v20 }
 0x2a6   : > { %899 = vrcp.f32 %v719_v21 }
 0x2b0   : > { %v900_v48 = vpop.eup %899 }
 0x2b1   : > { %722 = vst.msk [vmem:[%s257_s30] sm:$0x1] %vm263_vm0, %v900_v48 }
 0x2b2   : > { %944 = shalt.err (!%p941_p5)
}
 0x2b3   : > { %s945_s29 = scalar_lea.hbm %s1294_s24, 16  ;;  %s949_s28 = scalar_lea.hbm %s1349_s5, 32 }
 0x2b4   : > { %p946_p4 = scmp.ne.s32.totalorder %s1294_s24, %s945_s29  ;;  %p950_p12 = scmp.lt.u32.totalorder %s1294_s24, %s1349_s5 }
 0x2b5   : > { %p951_p1 = scmp.lt.u32.totalorder %s949_s28, %s945_s29  ;;  %p953_p8 = scmp.lt.u32.totalorder %s945_s29, %s1294_s24 }
 0x2b6   : > { %p947_p7 = pnand %p946_p4, %p1357_p9 }
 0x2b7   : > { %p952_p3 = por %p951_p1, %p950_p12 }
 0x2b8   : > { %p948_p10 = pneg %p947_p7 }
 0x2b9   : > { %p954_p11 = por %p953_p8, %p952_p3 }
 0x2bb   : > { %p955_p0 = pnand %p954_p11, %p948_p10 }
 0x2bd   : > { %958 = shalt.err (!%p955_p0)
}
 0x2be   : > { %829 = dma.vmem_to_hbm [thread:$0]  (%p1357_p9), %s1296_s14, 16, %s1294_s24, %s724_s9  }
 0x2bf PF: > { %s748_s30 = sand.u32 1, %s993_s18   ;;  %p1358_p6 = scmp.ne.s32.totalorder %s1354_s8, 0 }
 0x2c0   : > { %p1359_p13 = scmp.ge.s32.totalorder %s1013_s23, 2  ;;  %s749_s16 = scalar_lea.sflag [#allocation5], %s748_s30 }
 0x2c2   : > { %p836_p2 = pnand %p1359_p13, %p1358_p6 }
 0x2c4   : > { %988 = dma.done.wait (!%p836_p2), %s749_s16, 16  }
 0x2c5   : > { %990 = vsyncadd (!%p836_p2), %s749_s16, 4294967280  ;;  %s21_s23 = sadd.s32 1, %s1013_s23   ;;  %s1360_s18 = smov %s997_s19 }
 0x2c6   : > { %p18_p5 = scmp.ge.s32.totalorder %s21_s23, 4   ;;  %s1361_s19 = smov %s1001_s20 }
 0x2c7   : > { %s1362_s20 = smov %s1109_s7  ;;  %s1363_s21 = smov %s1009_s22 }
 0x2c8   : > { %s1364_s22 = smov %s1366_s26  ;;  %20 = sbr.rel (!%p18_p5) target bundleno = 6 (0x6), region = 93 }
 0x2cf   :  { %753 = vsyncpa [#allocation4], 1 }
 0x2d0   :  { %755 = vsyncpa [#allocation4 + $0x1], 1 }
 0x2d1   :  { %756 = vsyncpa [#allocation5], 1 }
 0x2d2   :  { %758 = vsyncpa [#allocation5 + $0x1], 1 }

</bundles_post_ra>
